<compile_context>
chip_gen: v6e
topology: v6e:2x2x1
jax: 0.10.0
libtpu: 0.0.40
codegen_flags: <defaults>
</compile_context>

<pallas_src>
import jax
import jax.numpy as jnp
from jax.experimental import pallas as pl
from jax.experimental.pallas import tpu as pltpu

HIDDEN = 16
LANE = 128
REST_COLS = HIDDEN + 4   # [w2 (16 cols) | b1 | b2 | w34^T | b34]


def mlp_kernel(x_ref, w1_ref, rest_ref, o_ref):
    # x_ref:    (bt, D)          matmul dtype (f32 or bf16), native HBM layout
    # w1_ref:   (16, D)          same dtype as x
    # rest_ref: (16, REST_COLS)  f32: [:, :16]=w2, [:,16]=b1, [:,17]=b2,
    #                                 [:,18]=w34^T, [:,19]=b34 (broadcast col)
    # o_ref:    (1, bt)          f32, lane-dense output slab
    x = x_ref[...]
    w1 = w1_ref[...]

    # Layer 1 (+ReLU): w1 @ x^T -> (16, bt).  Contracting the last dims of both
    # operands lets the MXU put the batch on lanes with no explicit transpose.
    h = jax.lax.dot_general(w1, x, (((1,), (1,)), ((), ())),
                            preferred_element_type=jnp.float32)
    h = jnp.maximum(h + rest_ref[:, HIDDEN:HIDDEN + 1], 0.0)

    # Layer 2 (+ReLU), f32 matmul (activations never touch HBM, so keep f32).
    h = jnp.dot(rest_ref[:, 0:HIDDEN], h, preferred_element_type=jnp.float32)
    h = jnp.maximum(h + rest_ref[:, HIDDEN + 1:HIDDEN + 2], 0.0)

    # Folded layers 3+4: (1,16) @ (16,bt) + b34, computed as a broadcast
    # multiply + sublane (XLU) reduction -> lane-dense (1, bt).
    w34t = rest_ref[:, HIDDEN + 2:HIDDEN + 3]            # (16, 1)
    out = jnp.sum(w34t * h, axis=0, keepdims=True)       # (1, bt)
    o_ref[...] = (out + rest_ref[0:1, HIDDEN + 3:HIDDEN + 4]).astype(o_ref.dtype)


def _pick_batch_tile(batch, d, x_bytes, vmem_budget_bytes, max_tile):
    """Largest lane-multiple batch tile that fits the VMEM budget.

    Per batch element (per lane):
      2 * d * x_bytes   double-buffered x block
      2 * 4             double-buffered (1, bt) f32 output block
      4 * HIDDEN * 4    ~4 live (16, bt) f32 activation values
    """
    per_elem = 2 * d * x_bytes + 2 * 4 + 4 * HIDDEN * 4
    bt = (vmem_budget_bytes // per_elem) // LANE * LANE
    bt = min(int(bt), int(max_tile), pl.cdiv(batch, LANE) * LANE)
    return max(LANE, bt)


def stock_model_forward(x, params, *, batch_tile=None,
                        vmem_budget_bytes=24 * 1024 * 1024,
                        max_batch_tile=32768):
    """Fused StockModel forward pass.

    x: (B, D), float32 or bfloat16.  Supplying bf16 halves HBM traffic on the
       dominant x stream (the recommended production configuration on all
       generations); accumulation stays f32 either way.
    params: PyTorch-layout weights w_i (out, in) and biases b_i (out,), f32.
    Returns (B, 1) float32.
    """
    B, D = x.shape
    x_bytes = jnp.dtype(x.dtype).itemsize

    if batch_tile is None:
        bt = _pick_batch_tile(B, D, x_bytes, vmem_budget_bytes, max_batch_tile)
    else:
        bt = max(LANE, (int(batch_tile) // LANE) * LANE)

    f32 = jnp.float32
    w1 = params["w1"].astype(x.dtype)                     # (16, D) matmul dtype
    w2 = params["w2"].astype(f32)                         # (16, 16)
    b1 = params["b1"].astype(f32).reshape(HIDDEN, 1)
    b2 = params["b2"].astype(f32).reshape(HIDDEN, 1)
    w3 = params["w3"].astype(f32)                         # (16, 16)
    w4 = params["w4"].astype(f32)                         # (1, 16)
    b3 = params["b3"].astype(f32).reshape(HIDDEN, 1)
    b4 = params["b4"].astype(f32).reshape(1, 1)

    # Fold layers 3+4 in f32 before any lower-precision cast.
    w34 = w4 @ w3                                          # (1, 16)
    b34 = w4 @ b3 + b4                                     # (1, 1)
    rest = jnp.concatenate(
        [w2, b1, b2, w34.T, jnp.broadcast_to(b34, (HIDDEN, 1))],
        axis=1)                                            # (16, REST_COLS) f32

    grid = (pl.cdiv(B, bt),)

    out = pl.pallas_call(
        mlp_kernel,
        out_shape=jax.ShapeDtypeStruct((1, B), jnp.float32),
        grid=grid,
        in_specs=[
            pl.BlockSpec((bt, D), lambda i: (i, 0)),              # x tile
            pl.BlockSpec((HIDDEN, D), lambda i: (0, 0)),          # w1 (fetched once)
            pl.BlockSpec((HIDDEN, REST_COLS), lambda i: (0, 0)),  # packed params
        ],
        out_specs=pl.BlockSpec((1, bt), lambda i: (0, i)),        # lane-dense out
        compiler_params=pltpu.CompilerParams(
            dimension_semantics=("parallel",),
            vmem_limit_bytes=48 * 1024 * 1024),
    )(x, w1, rest)

    # (1, B) -> (B, 1): element order unchanged, pure reshape.
    return out.reshape(B, 1)


def init_params(key, input_size):
    """nn.Linear-style init, PyTorch (out, in) weights and (out,) biases."""
    def linear(k, fan_in, fan_out):
        kw, kb = jax.random.split(k)
        bound = 1.0 / (fan_in ** 0.5)
        w = jax.random.uniform(kw, (fan_out, fan_in), jnp.float32, -bound, bound)
        b = jax.random.uniform(kb, (fan_out,), jnp.float32, -bound, bound)
        return w, b

    k1, k2, k3, k4 = jax.random.split(key, 4)
    w1, b1 = linear(k1, input_size, HIDDEN)
    w2, b2 = linear(k2, HIDDEN, HIDDEN)
    w3, b3 = linear(k3, HIDDEN, HIDDEN)
    w4, b4 = linear(k4, HIDDEN, 1)
    return dict(w1=w1, b1=b1, w2=w2, b2=b2, w3=w3, b3=b3, w4=w4, b4=b4)


def reference_forward(x, p):
    h = jnp.maximum(x @ p["w1"].T + p["b1"], 0.0)
    h = jnp.maximum(h @ p["w2"].T + p["b2"], 0.0)
    h = h @ p["w3"].T + p["b3"]
    return h @ p["w4"].T + p["b4"]


if __name__ == "__main__":
    key = jax.random.PRNGKey(0)
    k_params, k_x = jax.random.split(key)

    input_size = 32
    batch = 200   # deliberately NOT a multiple of 128 -> exercises masked edge block

    params = init_params(k_params, input_size)
    x = jax.random.normal(k_x, (batch, input_size), jnp.float32)
    ref = reference_forward(x, params)

    # f32 path, VMEM-budgeted (single-tile) grid.
    out = jax.block_until_ready(stock_model_forward(x, params))
    assert out.shape == (batch, 1)
    assert jnp.allclose(out, ref, atol=1e-4, rtol=1e-4), "f32 mismatch vs JAX reference"

    # Explicit small tile -> multi-step grid + partial final block.
    out_tiled = jax.block_until_ready(stock_model_forward(x, params, batch_tile=128))
    assert jnp.allclose(out_tiled, ref, atol=1e-4, rtol=1e-4), "tiled-grid mismatch"

    # bf16 x stream (recommended production config): halves HBM bytes on the
    # dominant stream; layer-2+ matmuls, bias/ReLU and accumulation stay f32.
    x_bf16 = x.astype(jnp.bfloat16)
    ref_bf16 = reference_forward(x_bf16.astype(jnp.float32), params)
    out_bf16 = jax.block_until_ready(stock_model_forward(x_bf16, params))
    assert out_bf16.shape == (batch, 1)
    assert jnp.allclose(out_bf16, ref_bf16, atol=5e-2, rtol=5e-2), "bf16 mismatch"

    print("KERNEL_OK")
</pallas_src>

<mosaic_0001>
module attributes {stable_mosaic.version = 11 : i64} {
  func.func @mlp_kernel(%arg0: i32, %arg1: memref<256x32xf32, #tpu.memory_space<vmem>>, %arg2: memref<16x32xf32, #tpu.memory_space<vmem>>, %arg3: memref<16x20xf32, #tpu.memory_space<vmem>>, %arg4: memref<1x256xf32, #tpu.memory_space<vmem>>) attributes {dimension_semantics = [#tpu.dimension_semantics<parallel>], iteration_bounds = array<i64: 1>, scalar_prefetch = 0 : i64, scratch_operands = 0 : i64, tpu.core_type = #tpu.core_type<tc>, window_params = [{transform_indices = @transform_0, window_bounds = array<i64: 256, 32>}, {pipeline_mode = #tpu.pipeline_mode<synchronous>, transform_indices = @transform_1, window_bounds = array<i64: 16, 32>}, {pipeline_mode = #tpu.pipeline_mode<synchronous>, transform_indices = @transform_2, window_bounds = array<i64: 16, 20>}, {transform_indices = @transform_3, window_bounds = array<i64: 1, 256>}]} {
    %c0 = arith.constant 0 : index
    %c0_0 = arith.constant 0 : index
    %0 = vector.load %arg1[%c0, %c0_0] : memref<256x32xf32, #tpu.memory_space<vmem>>, vector<256x32xf32>
    %c0_1 = arith.constant 0 : index
    %c0_2 = arith.constant 0 : index
    %1 = vector.load %arg2[%c0_1, %c0_2] : memref<16x32xf32, #tpu.memory_space<vmem>>, vector<16x32xf32>
    %cst = arith.constant dense<0.000000e+00> : vector<16x256xf32>
    %2 = tpu.matmul %1, %0, %cst {dimension_numbers = #tpu.dot_dimension_numbers<[1], [1], [0], [0], [0, 0, 1, 0], [], []>} : vector<16x32xf32>, vector<256x32xf32>, vector<16x256xf32> -> vector<16x256xf32>
    %c0_3 = arith.constant 0 : index
    %c16 = arith.constant 16 : index
    %3 = vector.load %arg3[%c0_3, %c16] : memref<16x20xf32, #tpu.memory_space<vmem>>, vector<16x1xf32>
    %4 = vector.broadcast %3 : vector<16x1xf32> to vector<16x256xf32>
    %5 = arith.addf %2, %4 : vector<16x256xf32>
    %cst_4 = arith.constant 0.000000e+00 : f32
    %6 = vector.broadcast %cst_4 : f32 to vector<16x256xf32>
    %7 = arith.maximumf %5, %6 : vector<16x256xf32>
    %c0_5 = arith.constant 0 : index
    %c0_6 = arith.constant 0 : index
    %8 = vector.load %arg3[%c0_5, %c0_6] : memref<16x20xf32, #tpu.memory_space<vmem>>, vector<16x16xf32>
    %cst_7 = arith.constant dense<0.000000e+00> : vector<16x256xf32>
    %9 = tpu.matmul %8, %7, %cst_7 {dimension_numbers = #tpu.dot_dimension_numbers<[1], [0], [0], [1], [0, 0, 1, 1], [], []>} : vector<16x16xf32>, vector<16x256xf32>, vector<16x256xf32> -> vector<16x256xf32>
    %c0_8 = arith.constant 0 : index
    %c17 = arith.constant 17 : index
    %10 = vector.load %arg3[%c0_8, %c17] : memref<16x20xf32, #tpu.memory_space<vmem>>, vector<16x1xf32>
    %11 = vector.broadcast %10 : vector<16x1xf32> to vector<16x256xf32>
    %12 = arith.addf %9, %11 : vector<16x256xf32>
    %cst_9 = arith.constant 0.000000e+00 : f32
    %13 = vector.broadcast %cst_9 : f32 to vector<16x256xf32>
    %14 = arith.maximumf %12, %13 : vector<16x256xf32>
    %c0_10 = arith.constant 0 : index
    %c18 = arith.constant 18 : index
    %15 = vector.load %arg3[%c0_10, %c18] : memref<16x20xf32, #tpu.memory_space<vmem>>, vector<16x1xf32>
    %16 = vector.broadcast %15 : vector<16x1xf32> to vector<16x256xf32>
    %17 = arith.mulf %16, %14 : vector<16x256xf32>
    %cst_11 = arith.constant dense<0.000000e+00> : vector<256xf32>
    %18 = vector.multi_reduction <add>, %17, %cst_11 [0] : vector<16x256xf32> to vector<256xf32>
    %19 = vector.shape_cast %18 : vector<256xf32> to vector<1x256xf32>
    %c0_12 = arith.constant 0 : index
    %c19 = arith.constant 19 : index
    %20 = vector.load %arg3[%c0_12, %c19] : memref<16x20xf32, #tpu.memory_space<vmem>>, vector<1x1xf32>
    %21 = vector.broadcast %20 : vector<1x1xf32> to vector<1x256xf32>
    %22 = arith.addf %19, %21 : vector<1x256xf32>
    %c0_13 = arith.constant 0 : index
    %c0_14 = arith.constant 0 : index
    %23 = vector.load %arg4[%c0_13, %c0_14] : memref<1x256xf32, #tpu.memory_space<vmem>>, vector<1x256xf32>
    tpu.vector_store %arg4[%c0_13, %c0_14], %22 {strides = array<i32>} : memref<1x256xf32, #tpu.memory_space<vmem>>, vector<1x256xf32>,
    return
  }
  func.func @transform_0(%arg0: i32) -> (i32, i32) {
    %c0_i32 = arith.constant 0 : i32
    %c0_i32_0 = arith.constant 0 : i32
    return %arg0, %c0_i32 : i32, i32
  }
  func.func @transform_1(%arg0: i32) -> (i32, i32) {
    %c0_i32 = arith.constant 0 : i32
    %c0_i32_0 = arith.constant 0 : i32
    %c0_i32_1 = arith.constant 0 : i32
    return %c0_i32, %c0_i32_0 : i32, i32
  }
  func.func @transform_2(%arg0: i32) -> (i32, i32) {
    %c0_i32 = arith.constant 0 : i32
    %c0_i32_0 = arith.constant 0 : i32
    %c0_i32_1 = arith.constant 0 : i32
    return %c0_i32, %c0_i32_0 : i32, i32
  }
  func.func @transform_3(%arg0: i32) -> (i32, i32) {
    %c0_i32 = arith.constant 0 : i32
    %c0_i32_0 = arith.constant 0 : i32
    return %c0_i32, %arg0 : i32, i32
  }
}

</mosaic_0001>

<bundles_post_ra>
// kernel: tpu_custom_call.1
= control target key start
LH: loop header
LB: loop body
LE: loop exit
PB: predicated region body
PF: predicated region fallthrough
CT: control target
= control target key end

     0   :  { %vm61_vm0 = vcmask 261120   ;;  %v517_v3 = vmov 16   ;;  %s706_s0 = inlined_call_operand.vmem [shape: f32[200,32], index: 0, kind: input, shape index: {}]   ;;  %s707_s1 = inlined_call_operand.vmem [shape: f32[16,32], index: 1, kind: input, shape index: {}]   ;;  %s708_s2 = inlined_call_operand.vmem [shape: f32[16,20], index: 2, kind: input, shape index: {}]   ;;  %s709_s3 = inlined_call_operand.hbm [shape: f32[1,200], index: 3, kind: output, shape index: {}]  }
   0x1   :  { %v46_v0 = vld [vmem:[%s706_s0 + $0xf8] sm:$0xff]  ;;  %v45_v2 = vld [vmem:[%s706_s0 + $0xf0] sm:$0xff]  ;;  %489 = vset.pattern.permute.xlu0 %v517_v3  ;;  %v44_v5 = vld [vmem:[%s706_s0 + $0xe8] sm:$0xff] }
   0x2   :  { %v30_v1 = vld [vmem:[%s706_s0 + $0x78] sm:$0xff]  ;;  %446 = vmatprep.subr.msk.mxu0 %vm61_vm0, %v46_v0  ;;  %v29_v4 = vld [vmem:[%s706_s0 + $0x70] sm:$0xff]  ;;  %v28_v6 = vld [vmem:[%s706_s0 + $0x68] sm:$0xff] }
   0x3   :  { %447 = vmatpush3.xpose.msk.msra.mxu0 %vm61_vm0, %v30_v1  ;;  %v43_v7 = vld [vmem:[%s706_s0 + $0xe0] sm:$0xff]  ;;  %v582_v10 = vld [vmem:[%s708_s2 + $0x8] sm:$0xff]  ;;  %v42_v11 = vld [vmem:[%s706_s0 + $0xd8] sm:$0xff] }
   0x4   :  { %448 = vmatprep.subr.msk.mxu0 %vm61_vm0, %v45_v2  ;;  %v47_v8 = vld [vmem:[%s707_s1] sm:$0xff]  ;;  %58 = vperm.xlu0 %489, %v582_v10  }
   0x5   :  { %v27_v9 = vld [vmem:[%s706_s0 + $0x60] sm:$0xff]  ;;  %478 = vmatprep.mubr.msk.f32.mxu0 %vm61_vm0, %v47_v8 }
   0x7   :  { %449 = vmatpush3.xpose.msk.msra.mxu0 %vm61_vm0, %v29_v4 }
   0x8   :  { %450 = vmatprep.subr.msk.mxu0 %vm61_vm0, %v44_v5 }
   0xb   :  { %451 = vmatpush3.xpose.msk.msra.mxu0 %vm61_vm0, %v28_v6 }
   0xc   :  { %452 = vmatprep.subr.msk.mxu0 %vm61_vm0, %v43_v7 }
   0xd   :  { %8 = vsyncpa [#allocation3], 0  ;;  %v591_v12 = vld [vmem:[%s708_s2] sm:$0xff]  ;;  %v26_v13 = vld [vmem:[%s706_s0 + $0x58] sm:$0xff]  ;;  %v518_v37 = vmov 0.0   ;;  %v519_v38 = vmov 17  }
   0xe   :  { %v41_v14 = vld [vmem:[%s706_s0 + $0xd0] sm:$0xff]  ;;  %53 = vperm.xlu0 %489, %v591_v12   ;;  %v40_v16 = vld [vmem:[%s706_s0 + $0xc8] sm:$0xff]  ;;  %v39_v18 = vld [vmem:[%s706_s0 + $0xc0] sm:$0xff]  ;;  %322 = vmatprep.mubr.f32.mxu1 %v518_v37  ;;  %v520_v39 = vmov 18   ;;  %v521_v40 = vmov 19   ;;  %vm253_vm1 = vcmask 130048  }
   0xf   :  { %453 = vmatpush3.xpose.msk.msra.mxu0 %vm61_vm0, %v27_v9  ;;  %v25_v15 = vld [vmem:[%s706_s0 + $0x50] sm:$0xff]  ;;  %v24_v17 = vld [vmem:[%s706_s0 + $0x48] sm:$0xff]  ;;  %v23_v19 = vld [vmem:[%s706_s0 + $0x40] sm:$0xff]  ;;  %490 = vset.pattern.permute.xlu1 %v519_v38 }
  0x10   :  { %454 = vmatprep.subr.msk.mxu0 %vm61_vm0, %v42_v11  ;;  %v38_v20 = vld [vmem:[%s706_s0 + $0xb8] sm:$0xff]  ;;  %v37_v22 = vld [vmem:[%s706_s0 + $0xb0] sm:$0xff]  ;;  %v36_v24 = vld [vmem:[%s706_s0 + $0xa8] sm:$0xff]  ;;  %246 = vperm.xlu1 %490, %v591_v12  }
  0x11   :  { %v22_v21 = vld [vmem:[%s706_s0 + $0x38] sm:$0xff]  ;;  %v21_v23 = vld [vmem:[%s706_s0 + $0x30] sm:$0xff]  ;;  %v20_v25 = vld [vmem:[%s706_s0 + $0x28] sm:$0xff] }
  0x12   :  { %v35_v26 = vld [vmem:[%s706_s0 + $0xa0] sm:$0xff]  ;;  %v34_v28 = vld [vmem:[%s706_s0 + $0x98] sm:$0xff]  ;;  %v33_v30 = vld [vmem:[%s706_s0 + $0x90] sm:$0xff]  ;;  %491 = vset.pattern.permute.xlu0 %v520_v39 }
  0x13   :  { %455 = vmatpush3.xpose.msk.msra.mxu0 %vm61_vm0, %v26_v13  ;;  %v19_v27 = vld [vmem:[%s706_s0 + $0x20] sm:$0xff]  ;;  %v18_v29 = vld [vmem:[%s706_s0 + $0x18] sm:$0xff]  ;;  %v17_v31 = vld [vmem:[%s706_s0 + $0x10] sm:$0xff]  ;;  %340 = vperm.xlu0 %491, %v591_v12  }
  0x14   :  { %456 = vmatprep.subr.msk.mxu0 %vm61_vm0, %v41_v14  ;;  %v32_v32 = vld [vmem:[%s706_s0 + $0x88] sm:$0xff]  ;;  %v31_v34 = vld [vmem:[%s706_s0 + $0x80] sm:$0xff]  ;;  %250 = vperm.xlu1 %490, %v582_v10  }
  0x15   :  { %v16_v33 = vld [vmem:[%s706_s0 + $0x8] sm:$0xff]  ;;  %v15_v35 = vld [vmem:[%s706_s0] sm:$0xff] }
  0x16   :  { %v48_v36 = vld [vmem:[%s707_s1 + $0x8] sm:$0xff]  ;;  %v365_v41 = vld [vmem:[%s708_s2] sm:$0x1]  ;;  %s523_s2 = smov [#allocation2]  }
  0x17   :  { %457 = vmatpush3.xpose.msk.msra.mxu0 %vm61_vm0, %v25_v15  ;;  %494 = vset.pattern.permute.xlu0 %v521_v40  ;;  %s402_s30 = sshll.u32 %s523_s2, 4  ;;  %s403_s30 = int_to_ptr.vmem [resolvable:$true] %s402_s30 }
  0x18   :  { %458 = vmatprep.subr.msk.mxu0 %vm61_vm0, %v40_v16  ;;  %492 = vset.pattern.permute.xlu1 %v520_v39  ;;  %s495_s4 = scalar_lea.vmem %s403_s30, 32  ;;  %p500_p1 = scmp.lt.s32.totalorder %s403_s30, %s403_s30 }
  0x19   :  { %344 = vperm.xlu1 %492, %v582_v10   ;;  %p496_p0 = scmp.ne.s32.totalorder %s403_s30, %s495_s4  ;;  %p501_p2 = scmp.lt.s32.totalorder %s495_s4, %s495_s4 }
  0x1b   :  { %459 = vmatpush3.xpose.msk.msra.mxu0 %vm61_vm0, %v24_v17  ;;  %p502_p3 = por %p501_p2, %p500_p1 }
  0x1c   :  { %460 = vmatprep.subr.msk.mxu0 %vm61_vm0, %v39_v18 }
  0x1d   :  { %493 = vset.pattern.permute.xlu1 %v521_v40  ;;  %p503_p4 = pnand %p502_p3, %p496_p0 }
  0x1e   :  { %368 = vperm.xlu1 %493, %v365_v41  }
  0x1f   :  { %461 = vmatpush3.xpose.msk.msra.mxu0 %vm61_vm0, %v23_v19  ;;  %v522_v19 = vmov 1966171168  }
  0x20   :  { %462 = vmatprep.subr.msk.mxu0 %vm61_vm0, %v38_v20  ;;  %v377_v20 = vunpack.c.l.s4 %v522_v19 }
  0x23   :  { %463 = vmatpush3.xpose.msk.msra.mxu0 %vm61_vm0, %v22_v21  ;;  %v379_v21 = vlaneseq }
  0x24   :  { %464 = vmatprep.subr.msk.mxu0 %vm61_vm0, %v37_v22 }
  0x25   :  { %vm393_vm2 = vcmp.lt.s32.totalorder %v379_v21, 256 }
  0x27   :  { %465 = vmatpush3.xpose.msk.msra.mxu0 %vm61_vm0, %v21_v23 }
  0x28   :  { %466 = vmatprep.subr.msk.mxu0 %vm61_vm0, %v36_v24 }
  0x2b   :  { %467 = vmatpush3.xpose.msk.msra.mxu0 %vm61_vm0, %v20_v25 }
  0x2c   :  { %468 = vmatprep.subr.msk.mxu0 %vm61_vm0, %v35_v26  ;;  %v378_v26 = vunpack.c.0.s8 %v377_v20 }
  0x2f   :  { %469 = vmatpush3.xpose.msk.msra.mxu0 %vm61_vm0, %v19_v27  ;;  %v380_v27 = vshrl.u32 %v379_v21, 7 }
  0x30   :  { %470 = vmatprep.subr.msk.mxu0 %vm61_vm0, %v34_v28 }
  0x33   :  { %471 = vmatpush3.xpose.msk.msra.mxu0 %vm61_vm0, %v18_v29 }
  0x34   :  { %472 = vmatprep.subr.msk.mxu0 %vm61_vm0, %v33_v30 }
  0x37   :  { %473 = vmatpush3.xpose.msk.msra.mxu0 %vm61_vm0, %v17_v31 }
  0x38   :  { %474 = vmatprep.subr.msk.mxu0 %vm61_vm0, %v32_v32  ;;  %v381_v32 = vsub.s32 %v378_v26, %v380_v27 }
  0x3b   :  { %475 = vmatpush3.xpose.msk.msra.mxu0 %vm61_vm0, %v16_v33 }
  0x3c   :  { %476 = vmatprep.subr.msk.mxu0 %vm61_vm0, %v31_v34 }
  0x3f   :  { %477 = vmatpush3.xpose.msk.msra.mxu0 %vm61_vm0, %v15_v35 }
  0x42   :  { %479 = vmatmul.mubr.msk.f32.vlgmr.msra.gmra.mxu0 %vm61_vm0, %v47_v8 }
  0x43   :  { %480 = vmatprep.mubr.msk.f32.mxu0 %vm61_vm0, %v48_v36 }
  0x46   :  { %481 = vmatmul.mubr.msk.f32.gmra.mxu0 %vm61_vm0, %v48_v36 }
  0x7f   :  { %v59_v42 = vpop.permute.xlu0 %58 }
  0x89   :  { %v54_v46 = vpop.permute.xlu0 %53 }
  0x8b   :  { %v247_v56 = vpop.permute.xlu1 %246 }
  0x8e   :  { %v341_v0 = vpop.permute.xlu0 %340 }
  0x8f   :  { %v251_v59 = vpop.permute.xlu1 %250 }
  0x94   :  { %v345_v3 = vpop.permute.xlu1 %344 }
  0x99   :  { %v369_v30 = vpop.permute.xlu1 %368 }
 0x102   :  { %v230_v43 = vpop.f32.mrf.mxu0 }
 0x103   :  { %v231_v51 = vadd.f32 %v230_v43, %v54_v46 }
 0x104   :  { %v232_v44 = vpop.f32.mrf.mxu0 }
 0x105   :  { %v233_v49 = vadd.f32 %v232_v44, %v54_v46  ;;  %v241_v55 = vmax.f32 %v231_v51, 0.0 }
 0x106   :  { %v236_v45 = vpop.f32.mrf.mxu0 }
 0x107   :  { %v237_v47 = vadd.f32 %v236_v45, %v59_v42  ;;  %v242_v54 = vmax.f32 %v233_v49, 0.0 }
 0x108   :  { %v238_v48 = vpop.f32.mrf.mxu0 }
 0x109   :  { %v239_v50 = vadd.f32 %v238_v48, %v59_v42  ;;  %v243_v53 = vmax.f32 %v237_v47, 0.0 }
 0x10b   :  { %v244_v52 = vmax.f32 %v239_v50, 0.0 }
 0x10d   :  { %286 = vmatprep.subr.mxu1 %v244_v52 }
 0x10e   :  { %287 = vmatpush1.msra.mxu1 %v243_v53 }
 0x10f   :  { %288 = vmatprep.subr.mxu1 %v242_v54 }
 0x110   :  { %289 = vmatpush1.msra.mxu1 %v241_v55 }
 0x111   :  { %444 = vmatmul.mubr.msk.f32.vlgmr.msra.gmra.mxu1 %vm253_vm1, %v591_v12 }
 0x112   :  { %328 = vmatprep.mubr.f32.mxu1 %v518_v37 }
 0x115   :  { %445 = vmatmul.mubr.msk.f32.gmra.mxu1 %vm253_vm1, %v582_v10 }
 0x1d1   :  { %v324_v57 = vpop.f32.mrf.mxu1 }
 0x1d2   :  { %v325_v58 = vadd.f32 %v324_v57, %v247_v56 }
 0x1d3   :  { %v326_v60 = vpop.f32.mrf.mxu1 }
 0x1d4   :  { %v327_v61 = vadd.f32 %v326_v60, %v247_v56  ;;  %v335_v63 = vmax.f32 %v325_v58, 0.0 }
 0x1d5   :  { %v330_v62 = vpop.f32.mrf.mxu1 }
 0x1d6   :  { %v331_v1 = vadd.f32 %v330_v62, %v251_v59  ;;  %v336_v4 = vmax.f32 %v327_v61, 0.0  ;;  %v347_v7 = vmul.f32 %v341_v0, %v335_v63 }
 0x1d7   :  { %v332_v2 = vpop.f32.mrf.mxu1 }
 0x1d8   :  { %v337_v5 = vmax.f32 %v331_v1, 0.0  ;;  %v333_v6 = vadd.f32 %v332_v2, %v251_v59  ;;  %v348_v11 = vmul.f32 %v341_v0, %v336_v4 }
 0x1da   :  { %v338_v8 = vmax.f32 %v333_v6, 0.0  ;;  %v349_v9 = vmul.f32 %v345_v3, %v337_v5 }
 0x1dc   :  { %v350_v10 = vmul.f32 %v345_v3, %v338_v8  ;;  %v351_v12 = vadd.f32 %v349_v9, %v347_v7 }
 0x1de   :  { %v352_v13 = vrot.slane %v351_v12, 4  ;;  %v358_v14 = vadd.f32 %v350_v10, %v348_v11 }
 0x1e0   :  { %v353_v15 = vadd.f32 %v352_v13, %v351_v12  ;;  %v359_v16 = vrot.slane %v358_v14, 4 }
 0x1e2   :  { %v360_v17 = vadd.f32 %v359_v16, %v358_v14  ;;  %v354_v18 = vrot.slane %v353_v15, 2 }
 0x1e4   :  { %v355_v22 = vadd.f32 %v354_v18, %v353_v15  ;;  %v361_v23 = vrot.slane %v360_v17, 2 }
 0x1e6   :  { %v356_v24 = vrot.slane %v355_v22, 1  ;;  %v362_v25 = vadd.f32 %v361_v23, %v360_v17 }
 0x1e8   :  { %v357_v28 = vadd.f32 %v356_v24, %v355_v22  ;;  %v363_v29 = vrot.slane %v362_v25, 1 }
 0x1ea   :  { %v364_v31 = vadd.f32 %v363_v29, %v362_v25  ;;  %v371_v33 = vadd.f32 %v369_v30, %v357_v28 }
 0x1ec   :  { %v372_v34 = vadd.f32 %v369_v30, %v364_v31 }
 0x1ee   :  { %v375_v35 = vcombine.low %v371_v33, %v372_v34 }
 0x1f0   :  { %v382_v36 = vrot.slane %v375_v35, %v381_v32 }
 0x1f2   :  { %v389_v37 = vrot.slane %v382_v36, %v381_v32 }
 0x1f4   :  { %395 = vst.msk [vmem:[#allocation2] sm:$0x3] %vm393_vm2, %v389_v37 }
 0x1f5   :  { %506 = shalt.err (!%p503_p4)
}
 0x1f6   :  { %405 = dma.vmem_to_hbm [thread:$0]  %s403_s30, 32, %s709_s3, [#allocation3]  }
 0x1f7   :  { %515 = dma.done.wait [#allocation3], 32  }
 0x1f8   :  { %516 = vsyncadd [#allocation3], 4294967264 }
 0x1f9   :  { %409 = vsyncpa [#allocation3], 1 }

</bundles_post_ra>
